<compile_context>
chip_gen: v7x
topology: tpu7x:2x2x1
jax: 0.10.0
libtpu: 0.0.40
codegen_flags: <defaults>
</compile_context>

<pallas_src>
import jax
import jax.numpy as jnp
from jax import lax
from jax.experimental import pallas as pl
from jax.experimental.pallas import tpu as pltpu


def _round_up(n, m):
    return ((n + m - 1) // m) * m


def _g_kernel(x_ref, w_ref, b_ref, o_ref):
    # o[m, o] = sum_k x[m, k] * w_eff[o, k]        (== x @ W_eff.T), f32 accumulate
    acc = lax.dot_general(
        x_ref[...], w_ref[...],
        dimension_numbers=(((1,), (1,)), ((), ())),
        preferred_element_type=jnp.float32,
    )
    o_ref[...] = (acc + b_ref[...]).astype(o_ref.dtype)


def g_forward(x, w1, bias1, w2, b2, *, block_batch=4096):
    """Pallas equivalent of G.forward.

    x:     (batch, input_dim)
    w1:    (hidden_dim, input_dim)  -- nn.Linear(input_dim, hidden_dim, bias=False).weight
           (pass None for the input_dim == 0 case)
    bias1: (hidden_dim,)            -- explicit nn.Parameter
    w2:    (output_dim, hidden_dim) -- nn.Linear(hidden_dim, output_dim).weight
    b2:    (output_dim,)            -- nn.Linear(hidden_dim, output_dim).bias
    returns (batch, output_dim)
    """
    if x.ndim < 2:
        raise RuntimeError("Must have batch dimension.")
    batch, input_dim = x.shape
    output_dim = w2.shape[0]

    # ---- algebraic fusion (f32) --------------------------------------------
    w2_f = w2.astype(jnp.float32)
    b_eff = bias1.astype(jnp.float32) @ w2_f.T + b2.astype(jnp.float32)   # (output_dim,)

    if w1 is None or input_dim == 0:
        # input_dim == 0 branch: linear2(bias1.repeat(batch, 1)) is a pure
        # broadcast of one precomputed row — no matmul over x.
        # TODO(synk): kept as plain JAX glue; a Pallas kernel here would be pure overhead.
        return jnp.broadcast_to(b_eff.astype(x.dtype), (batch, output_dim))

    w_eff = (w2_f @ w1.astype(jnp.float32)).astype(x.dtype)   # (output_dim, input_dim)
    b_eff_2d = b_eff.reshape(1, output_dim)                   # f32; added post-accumulation

    # ---- batch tiling (no wrapper-side pad) ---------------------------------
    # Large 128-aligned tiles amortize the ~0.35 us per-grid-step overhead and
    # keep the HBM streams wide; capped so that batch >= 256 still yields >= 2
    # grid steps (v7x has two TensorCores to shard the "parallel" axis across).
    # Tiny batches use a single full-array block (full-dim exception to the
    # (8,128) block constraint), so the degenerate case compiles cleanly.
    if batch >= 2 * 128:
        bt = min(_round_up(block_batch, 128), _round_up(pl.cdiv(batch, 2), 128))
    else:
        bt = batch
    grid = pl.cdiv(batch, bt)
    # NOTE: when batch % bt != 0 the trailing block is masked by Pallas; the
    # padded input rows are unspecified, but their results only land in output
    # rows whose stores are dropped (no cross-row reduction), so this is safe.

    out = pl.pallas_call(
        _g_kernel,
        out_shape=jax.ShapeDtypeStruct((batch, output_dim), x.dtype),
        grid=(grid,),
        in_specs=[
            # streamed per grid step
            pl.BlockSpec((bt, input_dim), lambda i: (i, 0)),
            # VMEM-resident across the whole grid (constant block index, ~2 KiB)
            pl.BlockSpec((output_dim, input_dim), lambda i: (0, 0)),
            pl.BlockSpec((1, output_dim), lambda i: (0, 0)),
        ],
        out_specs=pl.BlockSpec((bt, output_dim), lambda i: (i, 0)),
        compiler_params=pltpu.CompilerParams(
            dimension_semantics=("parallel",),
            vmem_limit_bytes=32 * 1024 * 1024,
        ),
    )(x, w_eff, b_eff_2d)
    return out


if __name__ == "__main__":
    # Deterministic synthetic parameters / inputs (no checkpoint load).
    input_dim, hidden_dim, output_dim = 32, 64, 16

    key = jax.random.PRNGKey(0)
    kx, kw1, kb1, kw2, kb2, kx2 = jax.random.split(key, 6)

    w1 = jax.random.normal(kw1, (hidden_dim, input_dim), dtype=jnp.float32) * 0.1
    bias1 = jax.random.normal(kb1, (hidden_dim,), dtype=jnp.float32)
    w2 = jax.random.normal(kw2, (output_dim, hidden_dim), dtype=jnp.float32) * 0.1
    b2 = jax.random.normal(kb2, (output_dim,), dtype=jnp.float32)

    def ref(xx):
        return (xx @ w1.T + bias1) @ w2.T + b2

    # Case 1: batch not a multiple of the tile -> grid of 2 with a masked
    # trailing block (exercises the no-pad path and the 2-step parallel grid:
    # bt = 256, grid = 2 for batch = 300).
    x_a = jax.random.normal(kx, (300, input_dim), dtype=jnp.float32)
    out_a = jax.block_until_ready(g_forward(x_a, w1, bias1, w2, b2))
    assert out_a.shape == (300, output_dim)
    assert jnp.allclose(out_a, ref(x_a), atol=1e-4, rtol=1e-4), "mismatch (tiled)"

    # Case 2: tiny non-8-multiple batch -> single full-array block, no padding.
    x_b = jax.random.normal(kx2, (10, input_dim), dtype=jnp.float32)
    out_b = jax.block_until_ready(g_forward(x_b, w1, bias1, w2, b2))
    assert out_b.shape == (10, output_dim)
    assert jnp.allclose(out_b, ref(x_b), atol=1e-4, rtol=1e-4), "mismatch (small)"

    # Case 3: input_dim == 0 branch (linear1 is None) -> plain JAX broadcast.
    x_c = jnp.zeros((7, 0), dtype=jnp.float32)
    out_c = jax.block_until_ready(g_forward(x_c, None, bias1, w2, b2))
    ref_c = jnp.broadcast_to(bias1 @ w2.T + b2, (7, output_dim))
    assert out_c.shape == (7, output_dim)
    assert jnp.allclose(out_c, ref_c, atol=1e-4, rtol=1e-4), "mismatch (no-input branch)"

    print("KERNEL_OK")
</pallas_src>

<mosaic_0001>
module attributes {stable_mosaic.version = 11 : i64} {
  func.func @_g_kernel(%arg0: i32, %arg1: memref<256x32xf32, #tpu.memory_space<vmem>>, %arg2: memref<16x32xf32, #tpu.memory_space<vmem>>, %arg3: memref<1x16xf32, #tpu.memory_space<vmem>>, %arg4: memref<256x16xf32, #tpu.memory_space<vmem>>) attributes {dimension_semantics = [#tpu.dimension_semantics<parallel>], iteration_bounds = array<i64: 2>, scalar_prefetch = 0 : i64, scratch_operands = 0 : i64, tpu.core_type = #tpu.core_type<tc>, window_params = [{transform_indices = @transform_0, window_bounds = array<i64: 256, 32>}, {pipeline_mode = #tpu.pipeline_mode<synchronous>, transform_indices = @transform_1, window_bounds = array<i64: 16, 32>}, {pipeline_mode = #tpu.pipeline_mode<synchronous>, transform_indices = @transform_2, window_bounds = array<i64: 1, 16>}, {transform_indices = @transform_3, window_bounds = array<i64: 256, 16>}]} {
    %c0 = arith.constant 0 : index
    %c0_0 = arith.constant 0 : index
    %0 = vector.load %arg1[%c0, %c0_0] : memref<256x32xf32, #tpu.memory_space<vmem>>, vector<256x32xf32>
    %c0_1 = arith.constant 0 : index
    %c0_2 = arith.constant 0 : index
    %1 = vector.load %arg2[%c0_1, %c0_2] : memref<16x32xf32, #tpu.memory_space<vmem>>, vector<16x32xf32>
    %cst = arith.constant dense<0.000000e+00> : vector<256x16xf32>
    %2 = tpu.matmul %0, %1, %cst {dimension_numbers = #tpu.dot_dimension_numbers<[1], [1], [0], [0], [0, 0, 1, 0], [], []>} : vector<256x32xf32>, vector<16x32xf32>, vector<256x16xf32> -> vector<256x16xf32>
    %c0_3 = arith.constant 0 : index
    %c0_4 = arith.constant 0 : index
    %3 = vector.load %arg3[%c0_3, %c0_4] : memref<1x16xf32, #tpu.memory_space<vmem>>, vector<1x16xf32>
    %4 = vector.broadcast %3 : vector<1x16xf32> to vector<256x16xf32>
    %5 = arith.addf %2, %4 : vector<256x16xf32>
    %c0_5 = arith.constant 0 : index
    %c0_6 = arith.constant 0 : index
    %6 = vector.load %arg4[%c0_5, %c0_6] : memref<256x16xf32, #tpu.memory_space<vmem>>, vector<256x16xf32>
    tpu.vector_store %arg4[%c0_5, %c0_6], %5 {strides = array<i32>} : memref<256x16xf32, #tpu.memory_space<vmem>>, vector<256x16xf32>,
    return
  }
  func.func @transform_0(%arg0: i32) -> (i32, i32) {
    %c0_i32 = arith.constant 0 : i32
    %c0_i32_0 = arith.constant 0 : i32
    return %arg0, %c0_i32 : i32, i32
  }
  func.func @transform_1(%arg0: i32) -> (i32, i32) {
    %c0_i32 = arith.constant 0 : i32
    %c0_i32_0 = arith.constant 0 : i32
    %c0_i32_1 = arith.constant 0 : i32
    return %c0_i32, %c0_i32_0 : i32, i32
  }
  func.func @transform_2(%arg0: i32) -> (i32, i32) {
    %c0_i32 = arith.constant 0 : i32
    %c0_i32_0 = arith.constant 0 : i32
    %c0_i32_1 = arith.constant 0 : i32
    return %c0_i32, %c0_i32_0 : i32, i32
  }
  func.func @transform_3(%arg0: i32) -> (i32, i32) {
    %c0_i32 = arith.constant 0 : i32
    %c0_i32_0 = arith.constant 0 : i32
    return %arg0, %c0_i32 : i32, i32
  }
}

</mosaic_0001>

<bundles_post_ra>
// kernel: tpu_custom_call.1
= control target key start
LH: loop header
LB: loop body
LE: loop exit
PB: predicated region body
PF: predicated region fallthrough
CT: control target
= control target key end

     0   :  { %s1285_s12 = smov 0   ;;  %s1287_s13 = smov 0   ;;  %s1639_s0 = inlined_call_operand.vmem [shape: f32[300,32], index: 0, kind: input, shape index: {}]   ;;  %s1640_s1 = inlined_call_operand.vmem [shape: f32[16,32], index: 1, kind: input, shape index: {}]   ;;  %s1641_s2 = inlined_call_operand.vmem [shape: f32[1,16], index: 2, kind: input, shape index: {}]   ;;  %s1642_s3 = inlined_call_operand.vmem [shape: f32[300,16], index: 3, kind: output, shape index: {}]  }
   0x1   :  { %s1289_s14 = smov 0  }
   0x2 LB: > { %s1298_s15 = sadd.s32 4294967295, %s1231_s14   ;;  %s1300_s16 = sadd.s32 1, %s1231_s14   ;;  %s1231_s14 = sphi %s1289_s14, %s1651_s14   ;;  %s1227_s13 = sphi %s1287_s13, %s1650_s13   ;;  %s1223_s12 = sphi %s1285_s12, %s1649_s12  }
   0x3   : > { %s85_s17 = ssub.s32 %s1231_s14, %s1300_s16  ;;  %s88_s18 = sadd.s32 1, %s1227_s13 }
   0x4   : > { %p86_p0 = scmp.eq.s32.totalorder %s85_s17, 0  ;;  %p98_p1 = scmp.ne.s32.totalorder %s1227_s13, %s1223_s12 }
   0x5   : > { %p99_p2 = scmp.eq.s32.totalorder %s1298_s15, 1  ;;  %p936_p3 = scmp.ge.s32.totalorder %s1231_s14, 1 }
   0x6   : > { %s1308_s19 = scalar_select %p86_p0, %s1227_s13, %s88_s18  }
   0x7   : > { %p1310_p4 = por %p99_p2, %p98_p1  ;;  %p146_p5 = scmp.lt.s32.totalorder %s1231_s14, 3 }
   0x9   : > { %p147_p6 = pnand %p936_p3, %p146_p5 }
   0xa   : > { %v224_v0 = vld [vmem:[%s1640_s1] sm:$0xff] (!%p147_p6)  ;;  %v225_v1 = vld [vmem:[%s1640_s1 + $0x8] sm:$0xff] (!%p147_p6)  ;;  %vm233_vm0 = vcmask (!%p147_p6), 261120   ;;  %s1321_s25 = sshll.u32 (!%p147_p6), %s1298_s15, 5  ;;  %s170_s4 = sand.u32 (!%p147_p6), 1, %s1223_s12   ;;  %vm561_vm2 = vcmask (!%p147_p6), 130048  }
   0xb   : > { %150 = sbr.rel (%p147_p6) target bundleno = 325 (0x145), region = 32  ;;  %v1081_v2 = vpack.c.bf16 (!%p147_p6), %v225_v1, %v224_v0  ;;  %vm1082_vm1 = vmpackc.low (!%p147_p6), %vm233_vm0, %vm233_vm0  ;;  %p178_p7 = scmp.lt.s32.totalorder (!%p147_p6), %s1321_s25, 37  ;;  %v1400_v35 = vld [vmem:[%s1641_s2] ss:$0 sm:$0xff] (!%p147_p6) }
   0xc   : > { %s937_s5 = sshll.u32 (!%p147_p6), %s170_s4, 8 }
   0xd   : > { %1083 = vmatprep.subr.msk.bf16.mxu0 (!%p147_p6), %vm1082_vm1, %v1081_v2  ;;  %1087 = vmatprep.subr.msk.bf16.mxu1 (!%p147_p6), %vm1082_vm1, %v1081_v2  ;;  %s1406_s8 = scalar_lea.vmem (!%p147_p6), [#allocation2], %s937_s5  }
   0xe   : > { %1086 = vmatpush3.bf16.xpose.msk.msra.mxu0 (!%p147_p6), %vm1082_vm1, %v1081_v2  ;;  %1088 = vmatpush3.bf16.xpose.msk.msra.mxu1 (!%p147_p6), %vm1082_vm1, %v1081_v2 }
  0x12   : > { %s179_s26 = scalar_select %p178_p7, %s1321_s25, 37 }
  0x13   : > { %s602_s9 = ssub.s32 (%p1310_p4), 38, %s1321_s25  ;;  %s992_s10 = sshll.u32 (%p1310_p4), %s1298_s15, 8 }
  0x14   : > { %s939_s27 = sshll.u32 %s179_s26, 3  ;;  %p603_p8 = scmp.lt.s32.totalorder (%p1310_p4), %s602_s9, 32 }
  0x15   : > { %s1330_s30 = scalar_lea.vmem %s1639_s0, %s939_s27  ;;  %s1507_s14 = scalar_lea.vmem (%p1310_p4), %s1642_s3, %s992_s10  }
  0x16   : > { %v192_v3 = vld [vmem:[%s1330_s30] sm:$0xff]  ;;  %v193_v5 = vld [vmem:[%s1330_s30 + $0x8] sm:$0xff]  ;;  %v194_v7 = vld [vmem:[%s1330_s30 + $0x10] sm:$0xff] }
  0x17   : > { %v208_v4 = vld [vmem:[%s1330_s30 + $0x80] sm:$0xff]  ;;  %1033 = vmatprep.mubr.msk.f32.mxu0 %vm233_vm0, %v192_v3  ;;  %v209_v6 = vld [vmem:[%s1330_s30 + $0x88] sm:$0xff]  ;;  %v210_v8 = vld [vmem:[%s1330_s30 + $0x90] sm:$0xff] }
  0x18   : > { %1057 = vmatprep.mubr.msk.f32.mxu1 %vm233_vm0, %v208_v4  ;;  %1034 = vmatmul.mubr.msk.f32.vlgmr.msra.gmra.mrb[0].mxu0 %vm233_vm0, %v193_v5  ;;  %v195_v9 = vld [vmem:[%s1330_s30 + $0x18] sm:$0xff]  ;;  %v196_v11 = vld [vmem:[%s1330_s30 + $0x20] sm:$0xff]  ;;  %v197_v13 = vld [vmem:[%s1330_s30 + $0x28] sm:$0xff] }
  0x19   : > { %1058 = vmatmul.mubr.msk.f32.vlgmr.msra.gmra.mrb[0].mxu1 %vm233_vm0, %v209_v6  ;;  %1036 = vmatprep.mubr.msk.f32.mxu0 %vm233_vm0, %v194_v7  ;;  %v211_v10 = vld [vmem:[%s1330_s30 + $0x98] sm:$0xff]  ;;  %v212_v12 = vld [vmem:[%s1330_s30 + $0xa0] sm:$0xff]  ;;  %v213_v14 = vld [vmem:[%s1330_s30 + $0xa8] sm:$0xff] }
  0x1a   : > { %1060 = vmatprep.mubr.msk.f32.mxu1 %vm233_vm0, %v210_v8  ;;  %v198_v15 = vld [vmem:[%s1330_s30 + $0x30] sm:$0xff]  ;;  %v199_v17 = vld [vmem:[%s1330_s30 + $0x38] sm:$0xff]  ;;  %v200_v19 = vld [vmem:[%s1330_s30 + $0x40] sm:$0xff] }
  0x1b   : > { %v214_v16 = vld [vmem:[%s1330_s30 + $0xb0] sm:$0xff]  ;;  %v215_v18 = vld [vmem:[%s1330_s30 + $0xb8] sm:$0xff]  ;;  %v216_v20 = vld [vmem:[%s1330_s30 + $0xc0] sm:$0xff] }
  0x1c   : > { %1037 = vmatmul.mubr.msk.f32.gmra.mrb[2].mxu0 %vm233_vm0, %v195_v9  ;;  %v201_v21 = vld [vmem:[%s1330_s30 + $0x48] sm:$0xff]  ;;  %v202_v23 = vld [vmem:[%s1330_s30 + $0x50] sm:$0xff]  ;;  %v203_v25 = vld [vmem:[%s1330_s30 + $0x58] sm:$0xff] }
  0x1d   : > { %1061 = vmatmul.mubr.msk.f32.gmra.mrb[2].mxu1 %vm233_vm0, %v211_v10  ;;  %1039 = vmatprep.mubr.msk.f32.mxu0 %vm233_vm0, %v196_v11  ;;  %v217_v22 = vld [vmem:[%s1330_s30 + $0xc8] sm:$0xff]  ;;  %v218_v24 = vld [vmem:[%s1330_s30 + $0xd0] sm:$0xff]  ;;  %v219_v26 = vld [vmem:[%s1330_s30 + $0xd8] sm:$0xff] }
  0x1e   : > { %1063 = vmatprep.mubr.msk.f32.mxu1 %vm233_vm0, %v212_v12  ;;  %v204_v27 = vld [vmem:[%s1330_s30 + $0x60] sm:$0xff]  ;;  %v205_v29 = vld [vmem:[%s1330_s30 + $0x68] sm:$0xff]  ;;  %v206_v31 = vld [vmem:[%s1330_s30 + $0x70] sm:$0xff] }
  0x1f   : > { %v220_v28 = vld [vmem:[%s1330_s30 + $0xe0] sm:$0xff]  ;;  %v221_v30 = vld [vmem:[%s1330_s30 + $0xe8] sm:$0xff]  ;;  %v222_v32 = vld [vmem:[%s1330_s30 + $0xf0] sm:$0xff] }
  0x20   : > { %1040 = vmatmul.mubr.msk.f32.gmra.mrb[4].mxu0 %vm233_vm0, %v197_v13  ;;  %v207_v33 = vld [vmem:[%s1330_s30 + $0x78] sm:$0xff] }
  0x21   : > { %1064 = vmatmul.mubr.msk.f32.gmra.mrb[4].mxu1 %vm233_vm0, %v213_v14  ;;  %1042 = vmatprep.mubr.msk.f32.mxu0 %vm233_vm0, %v198_v15  ;;  %v223_v34 = vld [vmem:[%s1330_s30 + $0xf8] sm:$0xff] }
  0x22   : > { %1066 = vmatprep.mubr.msk.f32.mxu1 %vm233_vm0, %v214_v16 }
  0x24   : > { %1043 = vmatmul.mubr.msk.f32.gmra.mrb[6].mxu0 %vm233_vm0, %v199_v17 }
  0x25   : > { %1067 = vmatmul.mubr.msk.f32.gmra.mrb[6].mxu1 %vm233_vm0, %v215_v18  ;;  %1045 = vmatprep.mubr.msk.f32.mxu0 %vm233_vm0, %v200_v19 }
  0x26   : > { %1069 = vmatprep.mubr.msk.f32.mxu1 %vm233_vm0, %v216_v20 }
  0x28   : > { %1046 = vmatmul.mubr.msk.f32.gmra.mrb[8].mxu0 %vm233_vm0, %v201_v21 }
  0x29   : > { %1070 = vmatmul.mubr.msk.f32.gmra.mrb[8].mxu1 %vm233_vm0, %v217_v22  ;;  %1048 = vmatprep.mubr.msk.f32.mxu0 %vm233_vm0, %v202_v23 }
  0x2a   : > { %1072 = vmatprep.mubr.msk.f32.mxu1 %vm233_vm0, %v218_v24 }
  0x2c   : > { %1049 = vmatmul.mubr.msk.f32.gmra.mrb[10].mxu0 %vm233_vm0, %v203_v25 }
  0x2d   : > { %1073 = vmatmul.mubr.msk.f32.gmra.mrb[10].mxu1 %vm233_vm0, %v219_v26  ;;  %1051 = vmatprep.mubr.msk.f32.mxu0 %vm233_vm0, %v204_v27 }
  0x2e   : > { %1075 = vmatprep.mubr.msk.f32.mxu1 %vm233_vm0, %v220_v28 }
  0x30   : > { %1052 = vmatmul.mubr.msk.f32.gmra.mrb[12].mxu0 %vm233_vm0, %v205_v29 }
  0x31   : > { %1076 = vmatmul.mubr.msk.f32.gmra.mrb[12].mxu1 %vm233_vm0, %v221_v30  ;;  %1054 = vmatprep.mubr.msk.f32.mxu0 %vm233_vm0, %v206_v31 }
  0x32   : > { %1078 = vmatprep.mubr.msk.f32.mxu1 %vm233_vm0, %v222_v32 }
  0x34   : > { %1055 = vmatmul.mubr.msk.f32.gmra.mrb[14].mxu0 %vm233_vm0, %v207_v33 }
  0x35   : > { %1079 = vmatmul.mubr.msk.f32.gmra.mrb[14].mxu1 %vm233_vm0, %v223_v34 }
  0xeb   : > { %v1035_v36 = vpop.f32.mrb[0].mxu0 }
  0xec   : > { %v1059_v37 = vpop.f32.mrb[0].mxu1  ;;  %v408_v38 = vadd.f32 %v1035_v36, %v1400_v35  ;;  %v402_v40 = vpop.f32.mrb[1].mxu0 }
  0xed   : > { %v488_v39 = vadd.f32 %v1059_v37, %v1400_v35  ;;  %v482_v41 = vpop.f32.mrb[1].mxu1  ;;  %v403_v42 = vadd.f32 %v1400_v35, %v402_v40 }
  0xee   : > { %v483_v43 = vadd.f32 %v1400_v35, %v482_v41  ;;  %563 = vst.msk [vmem:[%s1406_s8 + $0x8] sm:$0xff] %vm561_vm2, %v408_v38 }
  0xef   : > { %579 = vst.msk [vmem:[%s1406_s8 + $0x88] sm:$0xff] %vm561_vm2, %v488_v39  ;;  %562 = vst.msk [vmem:[%s1406_s8] sm:$0xff] %vm561_vm2, %v403_v42  ;;  %v1038_v44 = vpop.f32.mrb[2].mxu0 }
  0xf0   : > { %578 = vst.msk [vmem:[%s1406_s8 + $0x80] sm:$0xff] %vm561_vm2, %v483_v43  ;;  %v1062_v45 = vpop.f32.mrb[2].mxu1  ;;  %v418_v46 = vadd.f32 %v1038_v44, %v1400_v35  ;;  %v412_v48 = vpop.f32.mrb[3].mxu0 }
  0xf1   : > { %v498_v47 = vadd.f32 %v1062_v45, %v1400_v35  ;;  %v492_v49 = vpop.f32.mrb[3].mxu1  ;;  %v413_v50 = vadd.f32 %v1400_v35, %v412_v48 }
  0xf2   : > { %v493_v51 = vadd.f32 %v1400_v35, %v492_v49  ;;  %565 = vst.msk [vmem:[%s1406_s8 + $0x18] sm:$0xff] %vm561_vm2, %v418_v46 }
  0xf3   : > { %581 = vst.msk [vmem:[%s1406_s8 + $0x98] sm:$0xff] %vm561_vm2, %v498_v47  ;;  %564 = vst.msk [vmem:[%s1406_s8 + $0x10] sm:$0xff] %vm561_vm2, %v413_v50  ;;  %v1041_v52 = vpop.f32.mrb[4].mxu0 }
  0xf4   : > { %580 = vst.msk [vmem:[%s1406_s8 + $0x90] sm:$0xff] %vm561_vm2, %v493_v51  ;;  %v1065_v53 = vpop.f32.mrb[4].mxu1  ;;  %v428_v54 = vadd.f32 %v1041_v52, %v1400_v35  ;;  %v422_v56 = vpop.f32.mrb[5].mxu0 }
  0xf5   : > { %v508_v55 = vadd.f32 %v1065_v53, %v1400_v35  ;;  %v502_v57 = vpop.f32.mrb[5].mxu1  ;;  %v423_v58 = vadd.f32 %v1400_v35, %v422_v56 }
  0xf6   : > { %v503_v59 = vadd.f32 %v1400_v35, %v502_v57  ;;  %567 = vst.msk [vmem:[%s1406_s8 + $0x28] sm:$0xff] %vm561_vm2, %v428_v54 }
  0xf7   : > { %583 = vst.msk [vmem:[%s1406_s8 + $0xa8] sm:$0xff] %vm561_vm2, %v508_v55  ;;  %566 = vst.msk [vmem:[%s1406_s8 + $0x20] sm:$0xff] %vm561_vm2, %v423_v58  ;;  %v1044_v60 = vpop.f32.mrb[6].mxu0 }
  0xf8   : > { %582 = vst.msk [vmem:[%s1406_s8 + $0xa0] sm:$0xff] %vm561_vm2, %v503_v59  ;;  %v1068_v61 = vpop.f32.mrb[6].mxu1  ;;  %v438_v62 = vadd.f32 %v1044_v60, %v1400_v35  ;;  %v432_v0 = vpop.f32.mrb[7].mxu0 }
  0xf9   : > { %v518_v63 = vadd.f32 %v1068_v61, %v1400_v35  ;;  %v512_v1 = vpop.f32.mrb[7].mxu1  ;;  %v433_v2 = vadd.f32 %v1400_v35, %v432_v0 }
  0xfa   : > { %v513_v3 = vadd.f32 %v1400_v35, %v512_v1  ;;  %569 = vst.msk [vmem:[%s1406_s8 + $0x38] sm:$0xff] %vm561_vm2, %v438_v62 }
  0xfb   : > { %585 = vst.msk [vmem:[%s1406_s8 + $0xb8] sm:$0xff] %vm561_vm2, %v518_v63  ;;  %568 = vst.msk [vmem:[%s1406_s8 + $0x30] sm:$0xff] %vm561_vm2, %v433_v2  ;;  %v1047_v4 = vpop.f32.mrb[8].mxu0 }
  0xfc   : > { %584 = vst.msk [vmem:[%s1406_s8 + $0xb0] sm:$0xff] %vm561_vm2, %v513_v3  ;;  %v1071_v5 = vpop.f32.mrb[8].mxu1  ;;  %v448_v6 = vadd.f32 %v1047_v4, %v1400_v35  ;;  %v442_v8 = vpop.f32.mrb[9].mxu0 }
  0xfd   : > { %v528_v7 = vadd.f32 %v1071_v5, %v1400_v35  ;;  %v522_v9 = vpop.f32.mrb[9].mxu1  ;;  %v443_v10 = vadd.f32 %v1400_v35, %v442_v8 }
  0xfe   : > { %v523_v11 = vadd.f32 %v1400_v35, %v522_v9  ;;  %571 = vst.msk [vmem:[%s1406_s8 + $0x48] sm:$0xff] %vm561_vm2, %v448_v6 }
  0xff   : > { %587 = vst.msk [vmem:[%s1406_s8 + $0xc8] sm:$0xff] %vm561_vm2, %v528_v7  ;;  %570 = vst.msk [vmem:[%s1406_s8 + $0x40] sm:$0xff] %vm561_vm2, %v443_v10  ;;  %v1050_v12 = vpop.f32.mrb[10].mxu0 }
 0x100   : > { %586 = vst.msk [vmem:[%s1406_s8 + $0xc0] sm:$0xff] %vm561_vm2, %v523_v11  ;;  %v1074_v13 = vpop.f32.mrb[10].mxu1  ;;  %v458_v14 = vadd.f32 %v1050_v12, %v1400_v35  ;;  %v452_v16 = vpop.f32.mrb[11].mxu0 }
 0x101   : > { %v538_v15 = vadd.f32 %v1074_v13, %v1400_v35  ;;  %v532_v17 = vpop.f32.mrb[11].mxu1  ;;  %v453_v18 = vadd.f32 %v1400_v35, %v452_v16 }
 0x102   : > { %v533_v19 = vadd.f32 %v1400_v35, %v532_v17  ;;  %573 = vst.msk [vmem:[%s1406_s8 + $0x58] sm:$0xff] %vm561_vm2, %v458_v14 }
 0x103   : > { %589 = vst.msk [vmem:[%s1406_s8 + $0xd8] sm:$0xff] %vm561_vm2, %v538_v15  ;;  %572 = vst.msk [vmem:[%s1406_s8 + $0x50] sm:$0xff] %vm561_vm2, %v453_v18  ;;  %v1053_v20 = vpop.f32.mrb[12].mxu0 }
 0x104   : > { %588 = vst.msk [vmem:[%s1406_s8 + $0xd0] sm:$0xff] %vm561_vm2, %v533_v19  ;;  %v1077_v21 = vpop.f32.mrb[12].mxu1  ;;  %v468_v22 = vadd.f32 %v1053_v20, %v1400_v35  ;;  %v462_v24 = vpop.f32.mrb[13].mxu0 }
 0x105   : > { %v548_v23 = vadd.f32 %v1077_v21, %v1400_v35  ;;  %v542_v25 = vpop.f32.mrb[13].mxu1  ;;  %v463_v26 = vadd.f32 %v1400_v35, %v462_v24 }
 0x106   : > { %v543_v27 = vadd.f32 %v1400_v35, %v542_v25  ;;  %575 = vst.msk [vmem:[%s1406_s8 + $0x68] sm:$0xff] %vm561_vm2, %v468_v22  ;;  %600 = sbr.rel (!%p1310_p4) target bundleno = 325 (0x145), region = 36 }
 0x107   : > { %591 = vst.msk [vmem:[%s1406_s8 + $0xe8] sm:$0xff] %vm561_vm2, %v548_v23  ;;  %574 = vst.msk [vmem:[%s1406_s8 + $0x60] sm:$0xff] %vm561_vm2, %v463_v26  ;;  %v1056_v28 = vpop.f32.mrb[14].mxu0 }
 0x108   : > { %590 = vst.msk [vmem:[%s1406_s8 + $0xe0] sm:$0xff] %vm561_vm2, %v543_v27  ;;  %v1080_v29 = vpop.f32.mrb[14].mxu1  ;;  %v478_v30 = vadd.f32 %v1056_v28, %v1400_v35  ;;  %v472_v32 = vpop.f32.mrb[15].mxu0 }
 0x109   : > { %v558_v31 = vadd.f32 %v1080_v29, %v1400_v35  ;;  %v552_v33 = vpop.f32.mrb[15].mxu1  ;;  %v473_v34 = vadd.f32 %v1400_v35, %v472_v32 }
 0x10a   : > { %v553_v36 = vadd.f32 %v1400_v35, %v552_v33  ;;  %577 = vst.msk [vmem:[%s1406_s8 + $0x78] sm:$0xff] %vm561_vm2, %v478_v30 }
 0x10b   : > { %593 = vst.msk [vmem:[%s1406_s8 + $0xf8] sm:$0xff] %vm561_vm2, %v558_v31  ;;  %576 = vst.msk [vmem:[%s1406_s8 + $0x70] sm:$0xff] %vm561_vm2, %v473_v34 }
 0x10c   : > { %592 = vst.msk [vmem:[%s1406_s8 + $0xf0] sm:$0xff] %vm561_vm2, %v553_v36 }
 0x10d   : > { %s1653_s9 = smov (!%p603_p8, %s602_s9), 32 }
 0x10e   : > { %s977_s17 = sshll.u32 %s1653_s9, 7 }
 0x10f   : > { %p980_p9 = scmp.eq.s32.totalorder %s977_s17, 0 }
 0x110   : > { %s1513_s18 = sshrl.u32 (!%p980_p9), %s1653_s9, 5 }
 0x111   : > { %611 = sbr.rel (%p980_p9) target bundleno = 325 (0x145), region = 40  ;;  %p981_p10 = scmp.le.s32.totalorder (!%p980_p9), %s1513_s18, 0 }
 0x118   : > { %889 = sbr.rel (%p981_p10) target bundleno = 304 (0x130), region = 116  ;;  %s1644_s15 = smov (!%p981_p10), %s1507_s14 }
 0x119   : > { %s1645_s20 = smov (!%p981_p10), %s1406_s8  ;;  %s1522_s21 = smov (!%p981_p10), 0  }
 0x11a   : > { %s1524_s22 = smov (!%p981_p10), 0  }
 0x11f LB: >> { %v735_v35 = vld [vmem:[%s1239_s20] sm:$0xff]  ;;  %v737_v37 = vld [vmem:[%s1239_s20 + $0x8] sm:$0xff]  ;;  %v739_v38 = vld [vmem:[%s1239_s20 + $0x10] sm:$0xff]  ;;  %s799_s23 = sadd.s32 1, %s1243_s21  ;;  %s729_s22 = sadd.s32 1, %s1247_s22   ;;  %s1247_s22 = sphi %s1524_s22, %s729_s22   ;;  %s1243_s21 = sphi %s1522_s21, %s1648_s21   ;;  %s1239_s20 = sphi %s1645_s20, %s1647_s20   ;;  %s1235_s15 = sphi %s1644_s15, %s1646_s15  }
 0x120   : >> { %736 = vst [vmem:[%s1235_s15] sm:$0xff] %v735_v35  ;;  %738 = vst [vmem:[%s1235_s15 + $0x8] sm:$0xff] %v737_v37  ;;  %v741_v39 = vld [vmem:[%s1239_s20 + $0x18] sm:$0xff]  ;;  %v743_v40 = vld [vmem:[%s1239_s20 + $0x20] sm:$0xff]  ;;  %p800_p11 = scmp.ge.s32.totalorder %s799_s23, %s1513_s18  ;;  %p728_p12 = scmp.ge.s32.totalorder %s729_s22, %s1513_s18 }
 0x121   : >> { %740 = vst [vmem:[%s1235_s15 + $0x10] sm:$0xff] %v739_v38  ;;  %v745_v41 = vld [vmem:[%s1239_s20 + $0x28] sm:$0xff]  ;;  %742 = vst [vmem:[%s1235_s15 + $0x18] sm:$0xff] %v741_v39  ;;  %v747_v42 = vld [vmem:[%s1239_s20 + $0x30] sm:$0xff] }
 0x122   : >> { %744 = vst [vmem:[%s1235_s15 + $0x20] sm:$0xff] %v743_v40  ;;  %746 = vst [vmem:[%s1235_s15 + $0x28] sm:$0xff] %v745_v41  ;;  %v749_v43 = vld [vmem:[%s1239_s20 + $0x38] sm:$0xff]  ;;  %v751_v44 = vld [vmem:[%s1239_s20 + $0x40] sm:$0xff]  ;;  %s1655_s23 = smov (%p800_p11, %s799_s23), 0 }
 0x123   : >> { %748 = vst [vmem:[%s1235_s15 + $0x30] sm:$0xff] %v747_v42  ;;  %750 = vst [vmem:[%s1235_s15 + $0x38] sm:$0xff] %v749_v43  ;;  %v753_v45 = vld [vmem:[%s1239_s20 + $0x48] sm:$0xff]  ;;  %v755_v46 = vld [vmem:[%s1239_s20 + $0x50] sm:$0xff]  ;;  %s982_s24 = sshll.u32 %s1655_s23, 8  ;;  %s1648_s21 = smov %s1655_s23 }
 0x124   : >> { %752 = vst [vmem:[%s1235_s15 + $0x40] sm:$0xff] %v751_v44  ;;  %v757_v47 = vld [vmem:[%s1239_s20 + $0x58] sm:$0xff]  ;;  %754 = vst [vmem:[%s1235_s15 + $0x48] sm:$0xff] %v753_v45  ;;  %v759_v48 = vld [vmem:[%s1239_s20 + $0x60] sm:$0xff]  ;;  %s1580_s25 = scalar_lea.vmem %s1406_s8, %s982_s24 [#allocation2]   ;;  %s805_s26 = scalar_lea.vmem %s1507_s14, %s982_s24  }
 0x125   : >> { %756 = vst [vmem:[%s1235_s15 + $0x50] sm:$0xff] %v755_v46  ;;  %758 = vst [vmem:[%s1235_s15 + $0x58] sm:$0xff] %v757_v47  ;;  %v761_v49 = vld [vmem:[%s1239_s20 + $0x68] sm:$0xff]  ;;  %v763_v50 = vld [vmem:[%s1239_s20 + $0x70] sm:$0xff] }
 0x126   : >> { %760 = vst [vmem:[%s1235_s15 + $0x60] sm:$0xff] %v759_v48  ;;  %762 = vst [vmem:[%s1235_s15 + $0x68] sm:$0xff] %v761_v49  ;;  %v765_v51 = vld [vmem:[%s1239_s20 + $0x78] sm:$0xff]  ;;  %v767_v52 = vld [vmem:[%s1239_s20 + $0x80] sm:$0xff] }
 0x127   : >> { %764 = vst [vmem:[%s1235_s15 + $0x70] sm:$0xff] %v763_v50  ;;  %v769_v53 = vld [vmem:[%s1239_s20 + $0x88] sm:$0xff]  ;;  %766 = vst [vmem:[%s1235_s15 + $0x78] sm:$0xff] %v765_v51  ;;  %v771_v54 = vld [vmem:[%s1239_s20 + $0x90] sm:$0xff] }
 0x128   : >> { %768 = vst [vmem:[%s1235_s15 + $0x80] sm:$0xff] %v767_v52  ;;  %770 = vst [vmem:[%s1235_s15 + $0x88] sm:$0xff] %v769_v53  ;;  %v773_v55 = vld [vmem:[%s1239_s20 + $0x98] sm:$0xff]  ;;  %v775_v56 = vld [vmem:[%s1239_s20 + $0xa0] sm:$0xff] }
 0x129   : >> { %772 = vst [vmem:[%s1235_s15 + $0x90] sm:$0xff] %v771_v54  ;;  %774 = vst [vmem:[%s1235_s15 + $0x98] sm:$0xff] %v773_v55  ;;  %v777_v57 = vld [vmem:[%s1239_s20 + $0xa8] sm:$0xff]  ;;  %v779_v58 = vld [vmem:[%s1239_s20 + $0xb0] sm:$0xff]  ;;  %731 = sbr.rel (!%p728_p12) target bundleno = 287 (0x11f), region = 122 }
 0x12a   : >> { %776 = vst [vmem:[%s1235_s15 + $0xa0] sm:$0xff] %v775_v56  ;;  %v781_v59 = vld [vmem:[%s1239_s20 + $0xb8] sm:$0xff]  ;;  %778 = vst [vmem:[%s1235_s15 + $0xa8] sm:$0xff] %v777_v57  ;;  %v783_v60 = vld [vmem:[%s1239_s20 + $0xc0] sm:$0xff] }
 0x12b   : >> { %780 = vst [vmem:[%s1235_s15 + $0xb0] sm:$0xff] %v779_v58  ;;  %782 = vst [vmem:[%s1235_s15 + $0xb8] sm:$0xff] %v781_v59  ;;  %v785_v61 = vld [vmem:[%s1239_s20 + $0xc8] sm:$0xff]  ;;  %v787_v62 = vld [vmem:[%s1239_s20 + $0xd0] sm:$0xff] }
 0x12c   : >> { %784 = vst [vmem:[%s1235_s15 + $0xc0] sm:$0xff] %v783_v60  ;;  %786 = vst [vmem:[%s1235_s15 + $0xc8] sm:$0xff] %v785_v61  ;;  %v789_v63 = vld [vmem:[%s1239_s20 + $0xd8] sm:$0xff]  ;;  %v791_v0 = vld [vmem:[%s1239_s20 + $0xe0] sm:$0xff] }
 0x12d   : >> { %788 = vst [vmem:[%s1235_s15 + $0xd0] sm:$0xff] %v787_v62  ;;  %v793_v1 = vld [vmem:[%s1239_s20 + $0xe8] sm:$0xff]  ;;  %790 = vst [vmem:[%s1235_s15 + $0xd8] sm:$0xff] %v789_v63  ;;  %v795_v2 = vld [vmem:[%s1239_s20 + $0xf0] sm:$0xff] }
 0x12e   : >> { %792 = vst [vmem:[%s1235_s15 + $0xe0] sm:$0xff] %v791_v0  ;;  %794 = vst [vmem:[%s1235_s15 + $0xe8] sm:$0xff] %v793_v1  ;;  %v797_v3 = vld [vmem:[%s1239_s20 + $0xf8] sm:$0xff]  ;;  %s1647_s20 = smov %s1580_s25 }
 0x12f   : >> { %796 = vst [vmem:[%s1235_s15 + $0xf0] sm:$0xff] %v795_v2  ;;  %798 = vst [vmem:[%s1235_s15 + $0xf8] sm:$0xff] %v797_v3  ;;  %s1646_s15 = smov %s805_s26 }
 0x130 PF: > { %s1621_s27 = sand.u32 31, %s1653_s9   ;;  %s993_s28 = sshll.u32 %s1513_s18, 8 }
 0x131   : > { %s810_s29 = scalar_lea.vmem %s1406_s8, %s993_s28 [#allocation2]   ;;  %s812_s30 = scalar_lea.vmem %s1507_s14, %s993_s28  }
 0x132   : > { %p987_p13 = scmp.le.s32.totalorder %s1621_s27, 0 }
 0x133   : > { %s1249_s4 = smov (!%p987_p13), %s812_s30   ;;  %s1253_s5 = smov (!%p987_p13), %s810_s29  }
 0x134   : > { %903 = sbr.rel (%p987_p13) target bundleno = 325 (0x145), region = 127  ;;  %s1257_s6 = smov (!%p987_p13), 0  }
 0x135   : > { %s1261_s7 = smov (!%p987_p13), 0  }
 0x13b LB: >> { %v822_v4 = vld [vmem:[%s1255_s5] sm:$0xff]  ;;  %s824_s9 = sadd.s32 1, %s1259_s6  ;;  %s816_s7 = sadd.s32 1, %s1263_s7   ;;  %s1263_s7 = sphi %s1261_s7, %s816_s7   ;;  %s1259_s6 = sphi %s1257_s6, %s1258_s6   ;;  %s1255_s5 = sphi %s1253_s5, %s829_s5   ;;  %s1251_s4 = sphi %s1249_s4, %s830_s4  }
 0x13c   : >> { %823 = vst [vmem:[%s1251_s4] sm:$0xff] %v822_v4  ;;  %p825_p0 = scmp.ge.s32.totalorder %s824_s9, %s1621_s27  ;;  %p815_p1 = scmp.ge.s32.totalorder %s816_s7, %s1621_s27 }
 0x13e   : >> { %s1657_s9 = smov (%p825_p0, %s824_s9), 0  ;;  %818 = sbr.rel (!%p815_p1) target bundleno = 315 (0x13b), region = 133 }
 0x13f   : >> { %s988_s8 = sshll.u32 %s1657_s9, 3  ;;  %s1258_s6 = smov %s1657_s9  }
 0x140   : >> { %s829_s5 = scalar_lea.vmem %s810_s29, %s988_s8 [#allocation2]   ;;  %s830_s4 = scalar_lea.vmem %s812_s30, %s988_s8  }
 0x145 PF: > { %p10_p2 = scmp.ge.s32.totalorder %s1300_s16, 4   ;;  %s1649_s12 = smov %s1227_s13 }
 0x146   : > { %s1650_s13 = smov %s1308_s19  ;;  %s1651_s14 = smov %s1300_s16 }
 0x147   :  { %12 = sbr.rel (!%p10_p2) target bundleno = 2 (0x2), region = 144 }

</bundles_post_ra>
